<compile_context>
chip_gen: v7x
topology: tpu7x:2x2x1
jax: 0.10.0
libtpu: 0.0.40
codegen_flags: <defaults>
</compile_context>

<pallas_src>
import jax
import jax.numpy as jnp
from jax.experimental import pallas as pl
from jax.experimental.pallas import tpu as pltpu


# ---------------------------------------------------------------------------
# Hardware / tiling helpers
# ---------------------------------------------------------------------------

def _vmem_capacity_bytes() -> int:
    """Generation-aware VMEM capacity (falls back to the smallest, v7x 64 MiB)."""
    try:
        info = pltpu.get_tpu_info()
        cap = int(getattr(info, "vmem_capacity_bytes", 0) or 0)
        if cap > 0:
            return cap
    except Exception:
        pass
    return 64 << 20


def _estimate_vmem_bytes(tq, hw, heads, dim, dim_head, attn_itemsize, has_project):
    est = 2 * heads * tq * hw * attn_itemsize            # attn tile, double-buffered
    if attn_itemsize > 2:
        est += heads * tq * hw * 2                        # in-kernel bf16 copy of attn tile
    est += 2 * heads * hw * dim_head * 2                  # v (resident across q tiles)
    est += 2 * tq * dim * 4                               # residual tile (channels-last)
    est += 2 * tq * dim * 4                               # output tile
    est += tq * (dim + heads * dim_head) * 4              # f32 accumulator + per-head temp
    if has_project:
        est += 2 * heads * dim_head * dim * 2             # per-head projection weight
    est += 1 << 20                                        # misc / internal scratch slack
    return est


def _pick_q_tile(hw, heads, dim, dim_head, attn_itemsize, has_project,
                 budget_bytes, *, cap=2048, max_tile=None):
    """Largest query tile (multiple of 128) fitting the VMEM budget.

    Prefers tiles that divide HW exactly; otherwise the grid is cdiv(HW, tq)
    and the ragged last tile is handled by Pallas boundary masking.
    """
    hi = min(cap, -(-hw // 128) * 128)
    if max_tile is not None:
        hi = min(hi, max_tile)
    hi = max(hi, 128)
    best_div, best_any = None, None
    t = 128
    while t <= hi:
        if _estimate_vmem_bytes(t, hw, heads, dim, dim_head,
                                attn_itemsize, has_project) <= budget_bytes:
            best_any = t
            if hw % t == 0:
                best_div = t
        t += 128
    return best_div or best_any or 128


# ---------------------------------------------------------------------------
# Kernel
# ---------------------------------------------------------------------------

def _make_aggregate_kernel(heads: int, has_project: bool, needs_cast: bool):
    """Builds the fused attn@v (+projection) + residual kernel for one query tile."""

    def _body(attn_ref, v_ref, x_ref, wpT_ref, o_ref):
        # attn_ref: (1, heads, Tq, HW)  bf16 (preferred) or f32
        # v_ref   : (1, heads, HW, Dh)  bf16, gamma already folded in
        # x_ref   : (1, Tq, dim)        f32, channels-last residual tile
        # wpT_ref : (heads, Dh, dim)    bf16, Wp^T split per head (or None)
        # o_ref   : (1, Tq, dim)        f32, channels-last output tile
        acc = x_ref[0]                                       # (Tq, dim) f32 residual
        parts = []
        for h in range(heads):
            a = attn_ref[0, h]                               # (Tq, HW)
            if needs_cast:
                a = a.astype(jnp.bfloat16)
            # Canonical MXU form: lhs contracts on lanes, rhs on sublanes.
            o_h = jnp.dot(a, v_ref[0, h],
                          preferred_element_type=jnp.float32)        # (Tq, Dh)
            if has_project:
                acc = acc + jnp.dot(o_h.astype(jnp.bfloat16), wpT_ref[h],
                                    preferred_element_type=jnp.float32)  # (Tq, dim)
            else:
                parts.append(o_h)
        if not has_project:
            # dim == heads*Dh: per-head outputs are just channel slices.
            add = parts[0] if heads == 1 else jnp.concatenate(parts, axis=1)
            acc = acc + add
        o_ref[0] = acc.astype(o_ref.dtype)

    if has_project:
        def kernel(attn_ref, v_ref, x_ref, wpT_ref, o_ref):
            _body(attn_ref, v_ref, x_ref, wpT_ref, o_ref)
    else:
        def kernel(attn_ref, v_ref, x_ref, o_ref):
            _body(attn_ref, v_ref, x_ref, None, o_ref)
    return kernel


# ---------------------------------------------------------------------------
# Wrapper
# ---------------------------------------------------------------------------

def aggregate_forward(attn, fmap, to_v_weight, project_weight, gamma,
                      *, heads: int, dim_head: int, q_tile=None):
    """Forward pass of the GMA Aggregate module.

    Args:
      attn:           (B, heads, H*W, H*W) attention map.  Pass bf16 (emitted by
                      the upstream Attention kernel) for half the HBM traffic;
                      f32 is accepted and cast in-kernel.
      fmap:           (B, dim, H, W) feature map, NCHW like PyTorch.
      to_v_weight:    (inner, dim, 1, 1) -- nn.Conv2d(dim, inner, 1, bias=False).
      project_weight: (dim, inner, 1, 1) or None (when dim == inner).
      gamma:          scalar residual gate.
    Returns:
      (B, dim, H, W) float32 = fmap + gamma * project(attn @ to_v(fmap)).
    """
    B, dim, H, W = fmap.shape
    HW = H * W
    inner = heads * dim_head
    assert attn.shape == (B, heads, HW, HW), attn.shape
    assert to_v_weight.shape == (inner, dim, 1, 1), to_v_weight.shape

    has_project = project_weight is not None
    if not has_project:
        assert dim == inner, "project may only be omitted when dim == inner"

    attn_itemsize = jnp.dtype(attn.dtype).itemsize
    needs_cast = attn.dtype != jnp.bfloat16
    # TODO(synk): evaluate e4m3 fp8 attn storage on v7x (native fp8 MXU) once
    # accuracy at large HW is validated against the f32 reference.

    # ---- glue (plain JAX; all O(B*dim*HW), negligible vs the attn stream) ---
    x = fmap.reshape(B, dim, HW).astype(jnp.float32)
    x_cl = jnp.transpose(x, (0, 2, 1))                        # (B, HW, dim) residual
    wv = to_v_weight[:, :, 0, 0].reshape(heads, dim_head, dim).astype(jnp.float32)
    gamma_f = jnp.asarray(gamma, jnp.float32).reshape(())
    # Hoisted, per-batch v (channels-last per head), gamma folded in, bf16 for MXU.
    v = jnp.einsum("hdc,bcs->bhsd", wv, x)                    # (B, heads, HW, Dh) f32
    v = (gamma_f * v).astype(jnp.bfloat16)

    if has_project:
        assert project_weight.shape == (dim, inner, 1, 1), project_weight.shape
        wpT = jnp.transpose(project_weight[:, :, 0, 0], (1, 0))      # (inner, dim)
        wpT = wpT.reshape(heads, dim_head, dim).astype(jnp.bfloat16)

    # ---- generation-aware VMEM budget and query-tile choice -----------------
    cap_bytes = _vmem_capacity_bytes()
    budget = max(min(cap_bytes - (16 << 20), 100 << 20), 24 << 20)
    max_tile = None
    if B == 1 and HW > 128:
        # Keep >= 2 grid steps so both TensorCores get work on megacore parts.
        max_tile = max(128, ((HW - 1) // 128) * 128)
    if q_tile is not None:
        tq = int(q_tile)
    else:
        tq = _pick_q_tile(HW, heads, dim, dim_head, attn_itemsize, has_project,
                          budget, max_tile=max_tile)
        if HW < 128:
            tq = HW
    n_q = pl.cdiv(HW, tq)

    est = _estimate_vmem_bytes(tq, HW, heads, dim, dim_head, attn_itemsize, has_project)
    vmem_limit = int(min(budget, max(int(est * 1.5), 32 << 20)))

    kernel = _make_aggregate_kernel(heads, has_project, needs_cast)

    in_specs = [
        # attn query tile: the only large streamed input.
        pl.BlockSpec((1, heads, tq, HW), lambda b, qi: (b, 0, qi, 0)),
        # v: index depends only on b -> stays resident across query tiles.
        pl.BlockSpec((1, heads, HW, dim_head), lambda b, qi: (b, 0, 0, 0)),
        # residual tile (channels-last).
        pl.BlockSpec((1, tq, dim), lambda b, qi: (b, qi, 0)),
    ]
    args = [attn, v, x_cl]
    if has_project:
        in_specs.append(pl.BlockSpec((heads, dim_head, dim), lambda b, qi: (0, 0, 0)))
        args.append(wpT)

    out_cl = pl.pallas_call(
        kernel,
        out_shape=jax.ShapeDtypeStruct((B, HW, dim), jnp.float32),
        grid_spec=pltpu.PrefetchScalarGridSpec(
            num_scalar_prefetch=0,
            grid=(B, n_q),
            in_specs=in_specs,
            out_specs=pl.BlockSpec((1, tq, dim), lambda b, qi: (b, qi, 0)),
        ),
        compiler_params=pltpu.CompilerParams(
            dimension_semantics=("parallel", "parallel"),
            vmem_limit_bytes=vmem_limit,
        ),
    )(*args)

    return jnp.transpose(out_cl, (0, 2, 1)).reshape(B, dim, H, W)


# ---------------------------------------------------------------------------
# Pure-JAX reference (matches the PyTorch module)
# ---------------------------------------------------------------------------

def aggregate_reference(attn, fmap, to_v_weight, project_weight, gamma, heads, dim_head):
    B, dim, H, W = fmap.shape
    HW = H * W
    inner = heads * dim_head
    wv = to_v_weight[:, :, 0, 0]                              # (inner, dim)
    v = jnp.einsum("oc,bchw->bohw", wv, fmap)                 # 1x1 conv
    v = v.reshape(B, heads, dim_head, HW)                     # 'b (h d) x y'
    v = jnp.transpose(v, (0, 1, 3, 2))                        # (B, heads, HW, Dh)
    out = jnp.einsum("bhij,bhjd->bhid", attn.astype(jnp.float32), v)
    out = jnp.transpose(out, (0, 1, 3, 2)).reshape(B, inner, H, W)
    if project_weight is not None:
        wp = project_weight[:, :, 0, 0]
        out = jnp.einsum("oc,bchw->bohw", wp, out)
    return fmap + gamma * out


# ---------------------------------------------------------------------------
# Self-test
# ---------------------------------------------------------------------------

if __name__ == "__main__":
    key = jax.random.PRNGKey(0)

    # Case 1: dim != inner -> projection path.  HW = 256, q_tile=128 forces two
    # query tiles so the tiled residual / resident-v path is exercised.
    B, dim, H, W = 2, 32, 16, 16
    heads, dim_head = 2, 32                   # inner = 64
    HW = H * W
    inner = heads * dim_head
    k1, k2, k3, k4, k5 = jax.random.split(key, 5)
    fmap = jax.random.normal(k1, (B, dim, H, W), dtype=jnp.float32)
    attn = jax.nn.softmax(
        jax.random.normal(k2, (B, heads, HW, HW), dtype=jnp.float32), axis=-1
    ).astype(jnp.bfloat16)                    # upstream Attention emits bf16
    to_v_weight = jax.random.normal(k3, (inner, dim, 1, 1), dtype=jnp.float32) * 0.1
    project_weight = jax.random.normal(k4, (dim, inner, 1, 1), dtype=jnp.float32) * 0.1
    gamma = jnp.float32(0.5)

    out = aggregate_forward(attn, fmap, to_v_weight, project_weight, gamma,
                            heads=heads, dim_head=dim_head, q_tile=128)
    out = jax.block_until_ready(out)
    ref = aggregate_reference(attn, fmap, to_v_weight, project_weight, gamma,
                              heads, dim_head)
    assert out.shape == (B, dim, H, W)
    assert jnp.allclose(out, ref, atol=1e-2, rtol=1e-2), "mismatch (project path)"

    # Case 2: dim == inner -> no projection (the common MEMFOF configuration);
    # exercises the identity fast path (no matmul-by-I).
    dim2 = 64
    heads2, dim_head2 = 2, 32                 # inner = 64 == dim2
    fmap2 = jax.random.normal(k5, (B, dim2, H, W), dtype=jnp.float32)
    to_v_weight2 = jax.random.normal(k3, (dim2, dim2, 1, 1), dtype=jnp.float32) * 0.1
    gamma2 = jnp.float32(0.7)

    out2 = aggregate_forward(attn, fmap2, to_v_weight2, None, gamma2,
                             heads=heads2, dim_head=dim_head2, q_tile=128)
    out2 = jax.block_until_ready(out2)
    ref2 = aggregate_reference(attn, fmap2, to_v_weight2, None, gamma2,
                               heads2, dim_head2)
    assert out2.shape == (B, dim2, H, W)
    assert jnp.allclose(out2, ref2, atol=1e-2, rtol=1e-2), "mismatch (identity path)"

    print("KERNEL_OK")
</pallas_src>

<mosaic_0001>
module attributes {stable_mosaic.version = 11 : i64} {
  func.func @kernel(%arg0: i32, %arg1: i32, %arg2: memref<1x2x128x256xbf16, #tpu.memory_space<vmem>>, %arg3: memref<1x2x256x32xbf16, #tpu.memory_space<vmem>>, %arg4: memref<1x128x32xf32, #tpu.memory_space<vmem>>, %arg5: memref<2x32x32xbf16, #tpu.memory_space<vmem>>, %arg6: memref<1x128x32xf32, #tpu.memory_space<vmem>>) attributes {dimension_semantics = [#tpu.dimension_semantics<parallel>, #tpu.dimension_semantics<parallel>], iteration_bounds = array<i64: 2, 2>, scalar_prefetch = 0 : i64, scratch_operands = 0 : i64, tpu.core_type = #tpu.core_type<tc>, window_params = [{transform_indices = @transform_0, window_bounds = array<i64: 1, 2, 128, 256>}, {transform_indices = @transform_1, window_bounds = array<i64: 1, 2, 256, 32>}, {transform_indices = @transform_2, window_bounds = array<i64: 1, 128, 32>}, {pipeline_mode = #tpu.pipeline_mode<synchronous>, transform_indices = @transform_3, window_bounds = array<i64: 2, 32, 32>}, {transform_indices = @transform_4, window_bounds = array<i64: 1, 128, 32>}]} {
    %c0 = arith.constant 0 : index
    %c0_0 = arith.constant 0 : index
    %c0_1 = arith.constant 0 : index
    %0 = vector.load %arg4[%c0, %c0_0, %c0_1] : memref<1x128x32xf32, #tpu.memory_space<vmem>>, vector<1x128x32xf32>
    %1 = vector.shape_cast %0 : vector<1x128x32xf32> to vector<128x32xf32>
    %c0_2 = arith.constant 0 : index
    %c0_3 = arith.constant 0 : index
    %c0_4 = arith.constant 0 : index
    %c0_5 = arith.constant 0 : index
    %2 = vector.load %arg2[%c0_2, %c0_3, %c0_4, %c0_5] : memref<1x2x128x256xbf16, #tpu.memory_space<vmem>>, vector<1x1x128x256xbf16>
    %3 = vector.shape_cast %2 : vector<1x1x128x256xbf16> to vector<128x256xbf16>
    %c0_6 = arith.constant 0 : index
    %c0_7 = arith.constant 0 : index
    %c0_8 = arith.constant 0 : index
    %c0_9 = arith.constant 0 : index
    %4 = vector.load %arg3[%c0_6, %c0_7, %c0_8, %c0_9] : memref<1x2x256x32xbf16, #tpu.memory_space<vmem>>, vector<1x1x256x32xbf16>
    %5 = vector.shape_cast %4 : vector<1x1x256x32xbf16> to vector<256x32xbf16>
    %cst = arith.constant dense<0.000000e+00> : vector<128x32xf32>
    %6 = tpu.matmul %3, %5, %cst {dimension_numbers = #tpu.dot_dimension_numbers<[1], [0], [0], [1], [0, 0, 1, 1], [], []>} : vector<128x256xbf16>, vector<256x32xbf16>, vector<128x32xf32> -> vector<128x32xf32>
    %7 = arith.truncf %6 : vector<128x32xf32> to vector<128x32xbf16>
    %c0_10 = arith.constant 0 : index
    %c0_11 = arith.constant 0 : index
    %c0_12 = arith.constant 0 : index
    %8 = vector.load %arg5[%c0_10, %c0_11, %c0_12] : memref<2x32x32xbf16, #tpu.memory_space<vmem>>, vector<1x32x32xbf16>
    %9 = vector.shape_cast %8 : vector<1x32x32xbf16> to vector<32x32xbf16>
    %cst_13 = arith.constant dense<0.000000e+00> : vector<128x32xf32>
    %10 = tpu.matmul %7, %9, %cst_13 {dimension_numbers = #tpu.dot_dimension_numbers<[1], [0], [0], [1], [0, 0, 1, 1], [], []>} : vector<128x32xbf16>, vector<32x32xbf16>, vector<128x32xf32> -> vector<128x32xf32>
    %11 = arith.addf %1, %10 : vector<128x32xf32>
    %c0_14 = arith.constant 0 : index
    %c1 = arith.constant 1 : index
    %c0_15 = arith.constant 0 : index
    %c0_16 = arith.constant 0 : index
    %12 = vector.load %arg2[%c0_14, %c1, %c0_15, %c0_16] : memref<1x2x128x256xbf16, #tpu.memory_space<vmem>>, vector<1x1x128x256xbf16>
    %13 = vector.shape_cast %12 : vector<1x1x128x256xbf16> to vector<128x256xbf16>
    %c0_17 = arith.constant 0 : index
    %c1_18 = arith.constant 1 : index
    %c0_19 = arith.constant 0 : index
    %c0_20 = arith.constant 0 : index
    %14 = vector.load %arg3[%c0_17, %c1_18, %c0_19, %c0_20] : memref<1x2x256x32xbf16, #tpu.memory_space<vmem>>, vector<1x1x256x32xbf16>
    %15 = vector.shape_cast %14 : vector<1x1x256x32xbf16> to vector<256x32xbf16>
    %cst_21 = arith.constant dense<0.000000e+00> : vector<128x32xf32>
    %16 = tpu.matmul %13, %15, %cst_21 {dimension_numbers = #tpu.dot_dimension_numbers<[1], [0], [0], [1], [0, 0, 1, 1], [], []>} : vector<128x256xbf16>, vector<256x32xbf16>, vector<128x32xf32> -> vector<128x32xf32>
    %17 = arith.truncf %16 : vector<128x32xf32> to vector<128x32xbf16>
    %c1_22 = arith.constant 1 : index
    %c0_23 = arith.constant 0 : index
    %c0_24 = arith.constant 0 : index
    %18 = vector.load %arg5[%c1_22, %c0_23, %c0_24] : memref<2x32x32xbf16, #tpu.memory_space<vmem>>, vector<1x32x32xbf16>
    %19 = vector.shape_cast %18 : vector<1x32x32xbf16> to vector<32x32xbf16>
    %cst_25 = arith.constant dense<0.000000e+00> : vector<128x32xf32>
    %20 = tpu.matmul %17, %19, %cst_25 {dimension_numbers = #tpu.dot_dimension_numbers<[1], [0], [0], [1], [0, 0, 1, 1], [], []>} : vector<128x32xbf16>, vector<32x32xbf16>, vector<128x32xf32> -> vector<128x32xf32>
    %21 = arith.addf %11, %20 : vector<128x32xf32>
    %c0_26 = arith.constant 0 : index
    %c0_27 = arith.constant 0 : index
    %c0_28 = arith.constant 0 : index
    %22 = vector.load %arg6[%c0_26, %c0_27, %c0_28] : memref<1x128x32xf32, #tpu.memory_space<vmem>>, vector<1x128x32xf32>
    %23 = vector.shape_cast %22 : vector<1x128x32xf32> to vector<128x32xf32>
    %24 = vector.shape_cast %21 : vector<128x32xf32> to vector<1x128x32xf32>
    tpu.vector_store %arg6[%c0_26, %c0_27, %c0_28], %24 {strides = array<i32>} : memref<1x128x32xf32, #tpu.memory_space<vmem>>, vector<1x128x32xf32>,
    return
  }
  func.func @transform_0(%arg0: i32, %arg1: i32) -> (i32, i32, i32, i32) {
    %c0_i32 = arith.constant 0 : i32
    %c0_i32_0 = arith.constant 0 : i32
    %c0_i32_1 = arith.constant 0 : i32
    return %arg0, %c0_i32, %arg1, %c0_i32_0 : i32, i32, i32, i32
  }
  func.func @transform_1(%arg0: i32, %arg1: i32) -> (i32, i32, i32, i32) {
    %c0_i32 = arith.constant 0 : i32
    %c0_i32_0 = arith.constant 0 : i32
    %c0_i32_1 = arith.constant 0 : i32
    %c0_i32_2 = arith.constant 0 : i32
    return %arg0, %c0_i32, %c0_i32_0, %c0_i32_1 : i32, i32, i32, i32
  }
  func.func @transform_2(%arg0: i32, %arg1: i32) -> (i32, i32, i32) {
    %c0_i32 = arith.constant 0 : i32
    %c0_i32_0 = arith.constant 0 : i32
    return %arg0, %arg1, %c0_i32 : i32, i32, i32
  }
  func.func @transform_3(%arg0: i32, %arg1: i32) -> (i32, i32, i32) {
    %c0_i32 = arith.constant 0 : i32
    %c0_i32_0 = arith.constant 0 : i32
    %c0_i32_1 = arith.constant 0 : i32
    %c0_i32_2 = arith.constant 0 : i32
    return %c0_i32, %c0_i32_0, %c0_i32_1 : i32, i32, i32
  }
  func.func @transform_4(%arg0: i32, %arg1: i32) -> (i32, i32, i32) {
    %c0_i32 = arith.constant 0 : i32
    %c0_i32_0 = arith.constant 0 : i32
    return %arg0, %arg1, %c0_i32 : i32, i32, i32
  }
}

</mosaic_0001>

<bundles_post_ra>
// kernel: tpu_custom_call.1
= control target key start
LH: loop header
LB: loop body
LE: loop exit
PB: predicated region body
PF: predicated region fallthrough
CT: control target
= control target key end

     0   :  { %s2182_s15 = smov 0   ;;  %s2184_s16 = smov 0   ;;  %s2562_s0 = inlined_call_operand.vmem [shape: bf16[2,2,256,256], index: 0, kind: input, shape index: {}]   ;;  %s2563_s1 = inlined_call_operand.vmem [shape: bf16[2,2,256,32], index: 1, kind: input, shape index: {}]   ;;  %s2564_s2 = inlined_call_operand.vmem [shape: f32[2,256,32], index: 2, kind: input, shape index: {}]   ;;  %s2565_s3 = inlined_call_operand.vmem [shape: bf16[2,32,32], index: 3, kind: input, shape index: {}]   ;;  %s2566_s4 = inlined_call_operand.vmem [shape: f32[2,256,32], index: 4, kind: output, shape index: {}]  }
   0x1   :  { %s2186_s17 = smov 0   ;;  %s2188_s18 = smov 0  }
   0x2   :  { %s2190_s19 = smov 0   ;;  %s2192_s20 = smov 0  }
   0x3   :  { %s2194_s21 = smov 0  }
   0x4 LB: > { %s23_s22 = sadd.s32 1, %s2147_s19  ;;  %s26_s23 = sadd.s32 1, %s2151_s20  ;;  %s2155_s21 = sphi %s2194_s21, %s14_s21   ;;  %s2151_s20 = sphi %s2192_s20, %s2572_s20   ;;  %s2147_s19 = sphi %s2190_s19, %s2571_s19   ;;  %s2143_s18 = sphi %s2188_s18, %s2570_s18   ;;  %s2139_s17 = sphi %s2186_s17, %s2569_s17   ;;  %s2135_s16 = sphi %s2184_s16, %s2568_s16   ;;  %s2131_s15 = sphi %s2182_s15, %s2567_s15  }
   0x5   : > { %p24_p0 = scmp.ge.s32.totalorder %s23_s22, 2  ;;  %p42_p1 = scmp.ne.s32.totalorder %s2135_s16, %s2131_s15 }
   0x6   : > { %p43_p2 = scmp.eq.s32.totalorder %s2155_s21, 0  ;;  %s35_s27 = sadd.s32 1, %s2135_s16 }
   0x7   : > { %s2574_s22 = smov (%p24_p0, %s23_s22), 0  ;;  %s2576_s23 = smov (!%p24_p0, %s26_s23), %s2151_s20 }
   0x8   : > { %p44_p3 = por %p43_p2, %p42_p1  ;;  %p28_p4 = scmp.ge.s32.totalorder %s2576_s23, 2 }
   0x9   : > { %s31_s24 = ssub.s32 %s2147_s19, %s2574_s22  ;;  %p1569_p6 = scmp.ge.s32.totalorder %s2155_s21, 4 }
   0xa   : > { %s2578_s23 = smov (%p28_p4, %s2576_s23), 0 }
   0xb   : > { %s30_s25 = ssub.s32 %s2151_s20, %s2578_s23  ;;  %174 = sbr.rel (%p1569_p6) target bundleno = 41 (0x29), region = 20 }
   0xc   : > { %s32_s26 = sor.u32 %s31_s24, %s30_s25 }
   0xd   : > { %p33_p5 = scmp.eq.s32.totalorder %s32_s26, 0 }
   0xf   : > { %s2233_s28 = scalar_select %p33_p5, %s2135_s16, %s35_s27  }
  0x12   : > { %177 = sbr.rel (!%p44_p3) target bundleno = 41 (0x29), region = 24  ;;  %s179_s29 = sand.u32 (%p44_p3), 1, %s2135_s16  }
  0x13   : > { %s1723_s30 = sshll.u32 (%p44_p3), %s2147_s19, 5  ;;  %s1570_s5 = sshll.u32 (%p44_p3), %s179_s29, 8 }
  0x14   : > { %s1573_s6 = sshll.u32 (%p44_p3), %s2151_s20, 7  ;;  %s2247_s12 = scalar_lea.vmem (%p44_p3), [#allocation2], %s1570_s5 }
  0x15   : > { %s185_s7 = sadd.s32 (%p44_p3), %s1723_s30, %s1573_s6 }
  0x16   : > { %s1574_s8 = sshll.u32 (%p44_p3), %s185_s7, 2 }
  0x17   : > { %s2242_s11 = scalar_lea.vmem (%p44_p3), %s2562_s0, %s1574_s8 }
  0x18   : > { %v277_v0 = vld [vmem:[%s2242_s11] sm:$0xff] (%p44_p3)  ;;  %v279_v1 = vld [vmem:[%s2242_s11 + $0x8] sm:$0xff] (%p44_p3)  ;;  %v281_v2 = vld [vmem:[%s2242_s11 + $0x10] sm:$0xff] (%p44_p3) }
  0x19   : > { %278 = vst [vmem:[%s2247_s12] sm:$0xff] %v277_v0  ;;  %280 = vst [vmem:[%s2247_s12 + $0x8] sm:$0xff] %v279_v1  ;;  %v283_v3 = vld [vmem:[%s2242_s11 + $0x18] sm:$0xff]  ;;  %v285_v4 = vld [vmem:[%s2242_s11 + $0x20] sm:$0xff] }
  0x1a   : > { %282 = vst [vmem:[%s2247_s12 + $0x10] sm:$0xff] %v281_v2  ;;  %v287_v5 = vld [vmem:[%s2242_s11 + $0x28] sm:$0xff]  ;;  %284 = vst [vmem:[%s2247_s12 + $0x18] sm:$0xff] %v283_v3  ;;  %v289_v6 = vld [vmem:[%s2242_s11 + $0x30] sm:$0xff] }
  0x1b   : > { %286 = vst [vmem:[%s2247_s12 + $0x20] sm:$0xff] %v285_v4  ;;  %288 = vst [vmem:[%s2247_s12 + $0x28] sm:$0xff] %v287_v5  ;;  %v291_v7 = vld [vmem:[%s2242_s11 + $0x38] sm:$0xff]  ;;  %v293_v8 = vld [vmem:[%s2242_s11 + $0x40] sm:$0xff] }
  0x1c   : > { %290 = vst [vmem:[%s2247_s12 + $0x30] sm:$0xff] %v289_v6  ;;  %292 = vst [vmem:[%s2247_s12 + $0x38] sm:$0xff] %v291_v7  ;;  %v295_v9 = vld [vmem:[%s2242_s11 + $0x48] sm:$0xff]  ;;  %v297_v10 = vld [vmem:[%s2242_s11 + $0x50] sm:$0xff] }
  0x1d   : > { %294 = vst [vmem:[%s2247_s12 + $0x40] sm:$0xff] %v293_v8  ;;  %v299_v11 = vld [vmem:[%s2242_s11 + $0x58] sm:$0xff]  ;;  %296 = vst [vmem:[%s2247_s12 + $0x48] sm:$0xff] %v295_v9  ;;  %v301_v12 = vld [vmem:[%s2242_s11 + $0x60] sm:$0xff] }
  0x1e   : > { %298 = vst [vmem:[%s2247_s12 + $0x50] sm:$0xff] %v297_v10  ;;  %300 = vst [vmem:[%s2247_s12 + $0x58] sm:$0xff] %v299_v11  ;;  %v303_v13 = vld [vmem:[%s2242_s11 + $0x68] sm:$0xff]  ;;  %v305_v14 = vld [vmem:[%s2242_s11 + $0x70] sm:$0xff] }
  0x1f   : > { %302 = vst [vmem:[%s2247_s12 + $0x60] sm:$0xff] %v301_v12  ;;  %304 = vst [vmem:[%s2247_s12 + $0x68] sm:$0xff] %v303_v13  ;;  %v307_v15 = vld [vmem:[%s2242_s11 + $0x78] sm:$0xff]  ;;  %v309_v16 = vld [vmem:[%s2242_s11 + $0x100] sm:$0xff] }
  0x20   : > { %306 = vst [vmem:[%s2247_s12 + $0x70] sm:$0xff] %v305_v14  ;;  %v311_v17 = vld [vmem:[%s2242_s11 + $0x108] sm:$0xff]  ;;  %308 = vst [vmem:[%s2247_s12 + $0x78] sm:$0xff] %v307_v15  ;;  %v313_v18 = vld [vmem:[%s2242_s11 + $0x110] sm:$0xff] }
  0x21   : > { %310 = vst [vmem:[%s2247_s12 + $0x80] sm:$0xff] %v309_v16  ;;  %312 = vst [vmem:[%s2247_s12 + $0x88] sm:$0xff] %v311_v17  ;;  %v315_v19 = vld [vmem:[%s2242_s11 + $0x118] sm:$0xff]  ;;  %v317_v20 = vld [vmem:[%s2242_s11 + $0x120] sm:$0xff] }
  0x22   : > { %314 = vst [vmem:[%s2247_s12 + $0x90] sm:$0xff] %v313_v18  ;;  %316 = vst [vmem:[%s2247_s12 + $0x98] sm:$0xff] %v315_v19  ;;  %v319_v21 = vld [vmem:[%s2242_s11 + $0x128] sm:$0xff]  ;;  %v321_v22 = vld [vmem:[%s2242_s11 + $0x130] sm:$0xff] }
  0x23   : > { %318 = vst [vmem:[%s2247_s12 + $0xa0] sm:$0xff] %v317_v20  ;;  %v323_v23 = vld [vmem:[%s2242_s11 + $0x138] sm:$0xff]  ;;  %320 = vst [vmem:[%s2247_s12 + $0xa8] sm:$0xff] %v319_v21  ;;  %v325_v24 = vld [vmem:[%s2242_s11 + $0x140] sm:$0xff] }
  0x24   : > { %322 = vst [vmem:[%s2247_s12 + $0xb0] sm:$0xff] %v321_v22  ;;  %324 = vst [vmem:[%s2247_s12 + $0xb8] sm:$0xff] %v323_v23  ;;  %v327_v25 = vld [vmem:[%s2242_s11 + $0x148] sm:$0xff]  ;;  %v329_v26 = vld [vmem:[%s2242_s11 + $0x150] sm:$0xff] }
  0x25   : > { %326 = vst [vmem:[%s2247_s12 + $0xc0] sm:$0xff] %v325_v24  ;;  %328 = vst [vmem:[%s2247_s12 + $0xc8] sm:$0xff] %v327_v25  ;;  %v331_v27 = vld [vmem:[%s2242_s11 + $0x158] sm:$0xff]  ;;  %v333_v28 = vld [vmem:[%s2242_s11 + $0x160] sm:$0xff] }
  0x26   : > { %330 = vst [vmem:[%s2247_s12 + $0xd0] sm:$0xff] %v329_v26  ;;  %v335_v29 = vld [vmem:[%s2242_s11 + $0x168] sm:$0xff]  ;;  %332 = vst [vmem:[%s2247_s12 + $0xd8] sm:$0xff] %v331_v27  ;;  %v337_v30 = vld [vmem:[%s2242_s11 + $0x170] sm:$0xff] }
  0x27   : > { %334 = vst [vmem:[%s2247_s12 + $0xe0] sm:$0xff] %v333_v28  ;;  %336 = vst [vmem:[%s2247_s12 + $0xe8] sm:$0xff] %v335_v29  ;;  %v339_v31 = vld [vmem:[%s2242_s11 + $0x178] sm:$0xff] }
  0x28   : > { %338 = vst [vmem:[%s2247_s12 + $0xf0] sm:$0xff] %v337_v30  ;;  %340 = vst [vmem:[%s2247_s12 + $0xf8] sm:$0xff] %v339_v31 }
  0x29 PF: > { %p1575_p7 = scmp.ge.s32.totalorder %s2155_s21, 1  ;;  %p366_p8 = scmp.lt.s32.totalorder %s2155_s21, 5 }
  0x2b   : > { %p367_p9 = pnand %p1575_p7, %p366_p8 }
  0x2c   : > { %p417_p10 = scmp.lt.s32.totalorder (!%p367_p9), %s2143_s18, 1  ;;  %s373_s13 = sand.u32 (!%p367_p9), 1, %s2131_s15   ;;  %v2079_v20 = vld [vmem:[%s2565_s3] sm:$0xff] (!%p367_p9)   ;;  %v2080_v21 = vld [vmem:[%s2565_s3 + $0x8] sm:$0xff] (!%p367_p9)   ;;  %vm804_vm0 = vcmask (!%p367_p9), 261120  }
  0x2d   : > { %370 = sbr.rel (%p367_p9) target bundleno = 848 (0x350), region = 70  ;;  %s1576_s14 = sshll.u32 (!%p367_p9), %s373_s13, 8  ;;  %1873 = vmatprep.subr.bf16.mxu1 (!%p367_p9), %v2079_v20 }
  0x2e   : > { %s2318_s25 = scalar_lea.vmem (!%p367_p9), [#allocation2], %s1576_s14  ;;  %1874 = vmatpush3.bf16.msra.mxu1 (!%p367_p9), %v2079_v20  ;;  %s1579_s11 = sshll.u32 (!%p367_p9), %s2139_s17, 4 }
  0x2f   : > { %v2035_v32 = vld [vmem:[%s2318_s25 + $0x4] ss:$8 sps:$4 sm:$0xff] (!%p367_p9)   ;;  %v2033_v50 = vld [vmem:[%s2318_s25] ss:$8 sps:$4 sm:$0xff] (!%p367_p9)   ;;  %v2036_v51 = vld [vmem:[%s2318_s25 + $0x14] ss:$8 sps:$4 sm:$0xff] (!%p367_p9)   ;;  %1875 = vmatprep.subr.bf16.mxu1 (!%p367_p9), %v2080_v21 }
  0x30   : > { %715 = vmatprep.mubr.bf16.mxu0 (!%p367_p9), %v2035_v32  ;;  %v2038_v56 = vld [vmem:[%s2318_s25 + $0x10] ss:$8 sps:$4 sm:$0xff] (!%p367_p9)   ;;  %v2039_v57 = vld [vmem:[%s2318_s25 + $0x24] ss:$8 sps:$4 sm:$0xff] (!%p367_p9)   ;;  %v2041_v62 = vld [vmem:[%s2318_s25 + $0x20] ss:$8 sps:$4 sm:$0xff] (!%p367_p9)  }
  0x31   : > { %v2042_v63 = vld [vmem:[%s2318_s25 + $0x34] ss:$8 sps:$4 sm:$0xff] (!%p367_p9)   ;;  %v2044_v4 = vld [vmem:[%s2318_s25 + $0x30] ss:$8 sps:$4 sm:$0xff] (!%p367_p9)   ;;  %v2045_v5 = vld [vmem:[%s2318_s25 + $0x44] ss:$8 sps:$4 sm:$0xff] (!%p367_p9)  }
  0x32   : > { %v2047_v9 = vld [vmem:[%s2318_s25 + $0x40] ss:$8 sps:$4 sm:$0xff] (!%p367_p9)   ;;  %v2048_v10 = vld [vmem:[%s2318_s25 + $0x54] ss:$8 sps:$4 sm:$0xff] (!%p367_p9)   ;;  %v2050_v11 = vld [vmem:[%s2318_s25 + $0x50] ss:$8 sps:$4 sm:$0xff] (!%p367_p9)   ;;  %1876 = vmatpush3.bf16.msra.mxu1 (!%p367_p9), %v2080_v21 }
  0x33   : > { %v2051_v12 = vld [vmem:[%s2318_s25 + $0x64] ss:$8 sps:$4 sm:$0xff] (!%p367_p9)   ;;  %v2053_v13 = vld [vmem:[%s2318_s25 + $0x60] ss:$8 sps:$4 sm:$0xff] (!%p367_p9)   ;;  %v2054_v14 = vld [vmem:[%s2318_s25 + $0x74] ss:$8 sps:$4 sm:$0xff] (!%p367_p9)  }
  0x34   : > { %s2580_s18 = smov (!%p417_p10, %s2143_s18), 1  ;;  %v2056_v15 = vld [vmem:[%s2318_s25 + $0x70] ss:$8 sps:$4 sm:$0xff]   ;;  %v2075_v16 = vld [vmem:[%s2318_s25 + $0x84] ss:$8 sps:$4 sm:$0xff]   ;;  %p425_p11 = scmp.lt.s32.totalorder %s1579_s11, 31 }
  0x35   : > { %s1724_s24 = sshll.u32 %s2580_s18, 8  ;;  %v2073_v17 = vld [vmem:[%s2318_s25 + $0x80] ss:$8 sps:$4 sm:$0xff]   ;;  %v2076_v18 = vld [vmem:[%s2318_s25 + $0x94] ss:$8 sps:$4 sm:$0xff]   ;;  %s1580_s12 = sshll.u32 %s2580_s18, 5 }
  0x36   : > { %s2323_s29 = scalar_lea.vmem %s2563_s1, %s1724_s24  ;;  %v2078_v19 = vld [vmem:[%s2318_s25 + $0x90] ss:$8 sps:$4 sm:$0xff]   ;;  %v2081_v21 = vld [vmem:[%s2318_s25 + $0xa0] ss:$8 sps:$4 sm:$0xff]   ;;  %s2582_s11 = smov (!%p425_p11, %s1579_s11), 31 }
  0x37   : > { %v2017_v33 = vld [vmem:[%s2323_s29 + $0x40] sm:$0xff]   ;;  %v2019_v35 = vld [vmem:[%s2323_s29 + $0x48] sm:$0xff]   ;;  %v2021_v37 = vld [vmem:[%s2323_s29 + $0x50] sm:$0xff]   ;;  %s428_s13 = sadd.s32 %s1580_s12, %s2582_s11 }
  0x38   : > { %v2018_v34 = vld [vmem:[%s2323_s29] sm:$0xff]   ;;  %1725 = vmatprep.subr.bf16.mxu0 %v2017_v33  ;;  %v2020_v36 = vld [vmem:[%s2323_s29 + $0x8] sm:$0xff]   ;;  %v2022_v38 = vld [vmem:[%s2323_s29 + $0x10] sm:$0xff]   ;;  %s1581_s17 = sshll.u32 %s428_s13, 3 }
  0x39   : > { %1726 = vmatpush3.bf16.msra.mxu0 %v2018_v34  ;;  %v2023_v39 = vld [vmem:[%s2323_s29 + $0x58] sm:$0xff]   ;;  %v2025_v41 = vld [vmem:[%s2323_s29 + $0x60] sm:$0xff]   ;;  %v2027_v43 = vld [vmem:[%s2323_s29 + $0x68] sm:$0xff]   ;;  %s2492_s27 = scalar_lea.vmem %s2566_s4, %s1581_s17 }
  0x3a   : > { %1727 = vmatprep.subr.bf16.mxu0 %v2019_v35  ;;  %v2024_v40 = vld [vmem:[%s2323_s29 + $0x18] sm:$0xff]   ;;  %v2026_v42 = vld [vmem:[%s2323_s29 + $0x20] sm:$0xff]   ;;  %v2028_v44 = vld [vmem:[%s2323_s29 + $0x28] sm:$0xff]  }
  0x3b   : > { %v2029_v45 = vld [vmem:[%s2323_s29 + $0x70] sm:$0xff]   ;;  %v2031_v47 = vld [vmem:[%s2323_s29 + $0x78] sm:$0xff]   ;;  %v2343_v49 = vld [vmem:[%s2323_s29 + $0xc0] sm:$0xff]  }
  0x3c   : > { %v2030_v46 = vld [vmem:[%s2323_s29 + $0x30] sm:$0xff]   ;;  %v2032_v48 = vld [vmem:[%s2323_s29 + $0x38] sm:$0xff]   ;;  %v2348_v52 = vld [vmem:[%s2323_s29 + $0x80] sm:$0xff]   ;;  %1913 = vmatprep.subr.bf16.mxu1 %v2343_v49 }
  0x3d   : > { %1728 = vmatpush3.bf16.msra.mxu0 %v2020_v36  ;;  %v2352_v53 = vld [vmem:[%s2323_s29 + $0xc8] sm:$0xff]   ;;  %v2360_v55 = vld [vmem:[%s2323_s29 + $0xd0] sm:$0xff]   ;;  %v2370_v59 = vld [vmem:[%s2323_s29 + $0xd8] sm:$0xff]  }
  0x3e   : > { %1729 = vmatprep.subr.bf16.mxu0 %v2021_v37  ;;  %v2356_v54 = vld [vmem:[%s2323_s29 + $0x88] sm:$0xff]   ;;  %v2366_v58 = vld [vmem:[%s2323_s29 + $0x90] sm:$0xff]   ;;  %v2373_v60 = vld [vmem:[%s2323_s29 + $0x98] sm:$0xff]  }
  0x3f   : > { %v2377_v61 = vld [vmem:[%s2323_s29 + $0xe0] sm:$0xff]   ;;  %v2388_v1 = vld [vmem:[%s2323_s29 + $0xe8] sm:$0xff]   ;;  %v2396_v3 = vld [vmem:[%s2323_s29 + $0xf0] sm:$0xff]  }
  0x40   : > { %v2384_v0 = vld [vmem:[%s2323_s29 + $0xa0] sm:$0xff]   ;;  %v2392_v2 = vld [vmem:[%s2323_s29 + $0xa8] sm:$0xff]   ;;  %v2402_v6 = vld [vmem:[%s2323_s29 + $0xb0] sm:$0xff]  }
  0x41   : > { %1730 = vmatpush3.bf16.msra.mxu0 %v2022_v38  ;;  %v2406_v7 = vld [vmem:[%s2323_s29 + $0xf8] sm:$0xff]  }
  0x42   : > { %1731 = vmatprep.subr.bf16.mxu0 %v2023_v39  ;;  %v2410_v8 = vld [vmem:[%s2323_s29 + $0xb8] sm:$0xff]  }
  0x45   : > { %1732 = vmatpush3.bf16.msra.mxu0 %v2024_v40 }
  0x46   : > { %1733 = vmatprep.subr.bf16.mxu0 %v2025_v41 }
  0x49   : > { %1734 = vmatpush3.bf16.msra.mxu0 %v2026_v42 }
  0x4a   : > { %1735 = vmatprep.subr.bf16.mxu0 %v2027_v43 }
  0x4d   : > { %1736 = vmatpush3.bf16.msra.mxu0 %v2028_v44 }
  0x4e   : > { %1737 = vmatprep.subr.bf16.mxu0 %v2029_v45 }
  0x51   : > { %1738 = vmatpush3.bf16.msra.mxu0 %v2030_v46 }
  0x52   : > { %1739 = vmatprep.subr.bf16.mxu0 %v2031_v47 }
  0x55   : > { %1740 = vmatpush3.bf16.msra.mxu0 %v2032_v48 }
  0x56   : > { %1799 = vmatprep.subr.bf16.mxu0 %v2343_v49 }
  0x58   : > { %716 = vmatmul.mubr.bf16.vlgmr.msra.gmra.mrb[0].mxu0 %v2033_v50 }
  0x59   : > { %723 = vmatprep.mubr.bf16.mxu0 %v2036_v51  ;;  %1800 = vmatpush3.bf16.msra.mxu0 %v2348_v52 }
  0x5a   : > { %1801 = vmatprep.subr.bf16.mxu0 %v2352_v53 }
  0x5d   : > { %1802 = vmatpush3.bf16.msra.mxu0 %v2356_v54 }
  0x5e   : > { %1803 = vmatprep.subr.bf16.mxu0 %v2360_v55 }
  0x60   : > { %724 = vmatmul.mubr.bf16.gmra.mrb[4].mxu0 %v2038_v56 }
  0x61   : > { %731 = vmatprep.mubr.bf16.mxu0 %v2039_v57  ;;  %1804 = vmatpush3.bf16.msra.mxu0 %v2366_v58 }
  0x62   : > { %1805 = vmatprep.subr.bf16.mxu0 %v2370_v59 }
  0x65   : > { %1806 = vmatpush3.bf16.msra.mxu0 %v2373_v60 }
  0x66   : > { %1807 = vmatprep.subr.bf16.mxu0 %v2377_v61 }
  0x68   : > { %732 = vmatmul.mubr.bf16.gmra.mrb[8].mxu0 %v2041_v62 }
  0x69   : > { %739 = vmatprep.mubr.bf16.mxu0 %v2042_v63  ;;  %1808 = vmatpush3.bf16.msra.mxu0 %v2384_v0 }
  0x6a   : > { %1809 = vmatprep.subr.bf16.mxu0 %v2388_v1 }
  0x6d   : > { %1810 = vmatpush3.bf16.msra.mxu0 %v2392_v2 }
  0x6e   : > { %1811 = vmatprep.subr.bf16.mxu0 %v2396_v3 }
  0x70   : > { %740 = vmatmul.mubr.bf16.gmra.mrb[12].mxu0 %v2044_v4 }
  0x71   : > { %747 = vmatprep.mubr.bf16.mxu0 %v2045_v5  ;;  %1812 = vmatpush3.bf16.msra.mxu0 %v2402_v6 }
  0x72   : > { %1813 = vmatprep.subr.bf16.mxu0 %v2406_v7 }
  0x75   : > { %1814 = vmatpush3.bf16.msra.mxu0 %v2410_v8 }
  0x78   : > { %748 = vmatmul.mubr.bf16.gmra.mrb[16].mxu0 %v2047_v9 }
  0x79   : > { %755 = vmatprep.mubr.bf16.mxu0 %v2048_v10 }
  0x80   : > { %756 = vmatmul.mubr.bf16.gmra.mrb[20].mxu0 %v2050_v11 }
  0x81   : > { %763 = vmatprep.mubr.bf16.mxu0 %v2051_v12 }
  0x88   : > { %764 = vmatmul.mubr.bf16.gmra.mrb[24].mxu0 %v2053_v13 }
  0x89   : > { %771 = vmatprep.mubr.bf16.mxu0 %v2054_v14  ;;  %v2083_v14 = vld [vmem:[%s2318_s25 + $0xa4] ss:$8 sps:$4 sm:$0xff]  }
  0x90   : > { %772 = vmatmul.mubr.bf16.gmra.mrb[28].mxu0 %v2056_v15 }
  0x91   : > { %1200 = vmatprep.mubr.bf16.mxu0 %v2075_v16 }
  0x98   : > { %1201 = vmatmul.mubr.bf16.vlgmr.msra.gmra.mrb[32].mxu0 %v2073_v17 }
  0x99   : > { %1208 = vmatprep.mubr.bf16.mxu0 %v2076_v18 }
  0xa0   : > { %1209 = vmatmul.mubr.bf16.gmra.mrb[36].mxu0 %v2078_v19 }
 0x12b   : > { %v1741_v22 = vpop.f32.mrb[0].mxu0 }
 0x12c   : > { %v1742_v23 = vpop.f32.mrb[1].mxu0 }
 0x12d   : > { %v1743_v24 = vadd.f32 %v1742_v23, %v1741_v22  ;;  %v1744_v25 = vpop.f32.mrb[2].mxu0  ;;  %v2084_v23 = vld [vmem:[%s2318_s25 + $0xb4] ss:$8 sps:$4 sm:$0xff]  }
 0x12e   : > { %v1745_v26 = vpop.f32.mrb[3].mxu0 }
 0x12f   : > { %v1746_v27 = vadd.f32 %v1745_v26, %v1744_v25  ;;  %v2100_v25 = vld [vmem:[%s2565_s3 + $0x18] sm:$0xff]  }
 0x131   : > { %v780_v28 = vpack.c.bf16 %v1746_v27, %v1743_v24 }
 0x133   : > { %v1747_v29 = vpop.f32.mrb[4].mxu0  ;;  %1877 = vmatprep.mubr.msk.bf16.mxu1 %vm804_vm0, %v780_v28 }
 0x134   : > { %v1748_v30 = vpop.f32.mrb[5].mxu0 }
 0x135   : > { %v1749_v31 = vadd.f32 %v1748_v30, %v1747_v29  ;;  %v1750_v32 = vpop.f32.mrb[6].mxu0 }
 0x136   : > { %v1751_v33 = vpop.f32.mrb[7].mxu0 }
 0x137   : > { %v1752_v34 = vadd.f32 %v1751_v33, %v1750_v32  ;;  %v2087_v33 = vld [vmem:[%s2318_s25 + $0xc4] ss:$8 sps:$4 sm:$0xff]  }
 0x139   : > { %v781_v35 = vpack.c.bf16 %v1752_v34, %v1749_v31  ;;  %v2086_v31 = vld [vmem:[%s2318_s25 + $0xb0] ss:$8 sps:$4 sm:$0xff]  }
 0x13b   : > { %v1753_v36 = vpop.f32.mrb[8].mxu0  ;;  %1878 = vmatmul.mubr.msk.bf16.vlgmr.msra.gmra.mrb[0].mxu1 %vm804_vm0, %v781_v35  ;;  %v2089_v35 = vld [vmem:[%s2318_s25 + $0xc0] ss:$8 sps:$4 sm:$0xff]  }
 0x13c   : > { %v1754_v37 = vpop.f32.mrb[9].mxu0  ;;  %1921 = vmatpush3.bf16.msra.mxu1 %v2348_v52 }
 0x13d   : > { %v1755_v38 = vadd.f32 %v1754_v37, %v1753_v36  ;;  %v1756_v39 = vpop.f32.mrb[10].mxu0  ;;  %1914 = vmatprep.subr.bf16.mxu1 %v2352_v53  ;;  %v2090_v36 = vld [vmem:[%s2318_s25 + $0xd4] ss:$8 sps:$4 sm:$0xff]   ;;  %v2092_v37 = vld [vmem:[%s2318_s25 + $0xd0] ss:$8 sps:$4 sm:$0xff]  }
 0x13e   : > { %v1757_v40 = vpop.f32.mrb[11].mxu0 }
 0x13f   : > { %v1758_v41 = vadd.f32 %v1757_v40, %v1756_v39  ;;  %v2095_v39 = vld [vmem:[%s2318_s25 + $0xe0] ss:$8 sps:$4 sm:$0xff]   ;;  %v2096_v40 = vld [vmem:[%s2318_s25 + $0xf4] ss:$8 sps:$4 sm:$0xff]  }
 0x140   : > { %1922 = vmatpush3.bf16.msra.mxu1 %v2356_v54 }
 0x141   : > { %v782_v42 = vpack.c.bf16 %v1758_v41, %v1755_v38  ;;  %1915 = vmatprep.subr.bf16.mxu1 %v2360_v55  ;;  %v2093_v38 = vld [vmem:[%s2318_s25 + $0xe4] ss:$8 sps:$4 sm:$0xff]   ;;  %v2098_v41 = vld [vmem:[%s2318_s25 + $0xf0] ss:$8 sps:$4 sm:$0xff]   ;;  %s2485_s25 = scalar_lea.vmem %s2564_s2, %s1581_s17 }
 0x143   : > { %v1759_v43 = vpop.f32.mrb[12].mxu0  ;;  %1881 = vmatprep.mubr.msk.bf16.mxu1 %vm804_vm0, %v782_v42 }
 0x144   : > { %v1760_v44 = vpop.f32.mrb[13].mxu0  ;;  %1923 = vmatpush3.bf16.msra.mxu1 %v2366_v58 }
 0x145   : > { %v1761_v45 = vadd.f32 %v1760_v44, %v1759_v43  ;;  %v1762_v46 = vpop.f32.mrb[14].mxu0  ;;  %1916 = vmatprep.subr.bf16.mxu1 %v2370_v59 }
 0x146   : > { %v1763_v47 = vpop.f32.mrb[15].mxu0 }
 0x147   : > { %v1764_v48 = vadd.f32 %v1763_v47, %v1762_v46 }
 0x148   : > { %1924 = vmatpush3.bf16.msra.mxu1 %v2373_v60 }
 0x149   : > { %v783_v49 = vpack.c.bf16 %v1764_v48, %v1761_v45  ;;  %1917 = vmatprep.subr.bf16.mxu1 %v2377_v61  ;;  %v2099_v61 = vld [vmem:[%s2565_s3 + $0x10] sm:$0xff]  }
 0x14b   : > { %v1765_v50 = vpop.f32.mrb[16].mxu0  ;;  %1882 = vmatmul.mubr.msk.bf16.gmra.mrb[4].mxu1 %vm804_vm0, %v783_v49 }
 0x14c   : > { %v1766_v51 = vpop.f32.mrb[17].mxu0  ;;  %1925 = vmatpush3.bf16.msra.mxu1 %v2384_v0 }
 0x14d   : > { %v1767_v52 = vadd.f32 %v1766_v51, %v1765_v50  ;;  %v1768_v53 = vpop.f32.mrb[18].mxu0  ;;  %1918 = vmatprep.subr.bf16.mxu1 %v2388_v1 }
 0x14e   : > { %v1769_v54 = vpop.f32.mrb[19].mxu0 }
 0x14f   : > { %v1770_v55 = vadd.f32 %v1769_v54, %v1768_v53 }
 0x150   : > { %1926 = vmatpush3.bf16.msra.mxu1 %v2392_v2 }
 0x151   : > { %v784_v56 = vpack.c.bf16 %v1770_v55, %v1767_v52  ;;  %1919 = vmatprep.subr.bf16.mxu1 %v2396_v3 }
 0x153   : > { %v1771_v57 = vpop.f32.mrb[20].mxu0  ;;  %1885 = vmatprep.mubr.msk.bf16.mxu1 %vm804_vm0, %v784_v56 }
 0x154   : > { %v1772_v58 = vpop.f32.mrb[21].mxu0  ;;  %1927 = vmatpush3.bf16.msra.mxu1 %v2402_v6 }
 0x155   : > { %v1773_v59 = vadd.f32 %v1772_v58, %v1771_v57  ;;  %v1774_v60 = vpop.f32.mrb[22].mxu0  ;;  %1920 = vmatprep.subr.bf16.mxu1 %v2406_v7 }
 0x156   : > { %v1775_v62 = vpop.f32.mrb[23].mxu0 }
 0x157   : > { %v1776_v63 = vadd.f32 %v1775_v62, %v1774_v60 }
 0x158   : > { %1928 = vmatpush3.bf16.msra.mxu1 %v2410_v8 }
 0x159   : > { %v785_v0 = vpack.c.bf16 %v1776_v63, %v1773_v59  ;;  %1893 = vmatprep.subr.bf16.mxu1 %v2099_v61 }
 0x15b   : > { %v1777_v1 = vpop.f32.mrb[24].mxu0  ;;  %1886 = vmatmul.mubr.msk.bf16.gmra.mrb[8].mxu1 %vm804_vm0, %v785_v0 }
 0x15c   : > { %v1778_v2 = vpop.f32.mrb[25].mxu0 }
 0x15d   : > { %v1779_v3 = vadd.f32 %v1778_v2, %v1777_v1  ;;  %v1780_v4 = vpop.f32.mrb[26].mxu0 }
 0x15e   : > { %v1781_v5 = vpop.f32.mrb[27].mxu0 }
 0x15f   : > { %v1782_v6 = vadd.f32 %v1781_v5, %v1780_v4 }
 0x161   : > { %v786_v7 = vpack.c.bf16 %v1782_v6, %v1779_v3 }
 0x163   : > { %v1783_v9 = vpop.f32.mrb[28].mxu0  ;;  %1889 = vmatprep.mubr.msk.bf16.mxu1 %vm804_vm0, %v786_v7 }
 0x164   : > { %v1784_v10 = vpop.f32.mrb[29].mxu0 }
 0x165   : > { %v1785_v11 = vadd.f32 %v1784_v10, %v1783_v9  ;;  %v1786_v8 = vpop.f32.mrb[30].mxu0 }
 0x166   : > { %v1787_v12 = vpop.f32.mrb[31].mxu0 }
 0x167   : > { %v1788_v13 = vadd.f32 %v1787_v12, %v1786_v8 }
 0x169   : > { %v787_v15 = vpack.c.bf16 %v1788_v13, %v1785_v11 }
 0x16b   : > { %1890 = vmatmul.mubr.msk.bf16.gmra.mrb[12].mxu1 %vm804_vm0, %v787_v15  ;;  %v1815_v16 = vpop.f32.mrb[32].mxu0 }
 0x16c   : > { %1216 = vmatprep.mubr.bf16.mxu1 %v2083_v14  ;;  %v1816_v17 = vpop.f32.mrb[33].mxu0 }
 0x16d   : > { %v1817_v18 = vadd.f32 %v1816_v17, %v1815_v16  ;;  %v1818_v19 = vpop.f32.mrb[34].mxu0 }
 0x16e   : > { %v1819_v20 = vpop.f32.mrb[35].mxu0 }
 0x16f   : > { %v1820_v22 = vadd.f32 %v1819_v20, %v1818_v19  ;;  %v445_v20 = vld [vmem:[%s2485_s25 + $0x10] sm:$0xff] }
 0x171   : > { %v1265_v24 = vpack.c.bf16 %v1820_v22, %v1817_v18 }
 0x173   : > { %1217 = vmatmul.mubr.bf16.vlgmr.msra.gmra.mrb[16].mxu1 %v2081_v21  ;;  %v1821_v26 = vpop.f32.mrb[36].mxu0  ;;  %v443_v21 = vld [vmem:[%s2485_s25] sm:$0xff] }
 0x174   : > { %1224 = vmatprep.mubr.bf16.mxu1 %v2084_v23  ;;  %v1822_v27 = vpop.f32.mrb[37].mxu0  ;;  %1894 = vmatpush3.bf16.msra.mxu1 %v2099_v61  ;;  %v446_v23 = vld [vmem:[%s2485_s25 + $0x18] sm:$0xff] }
 0x175   : > { %v1823_v28 = vadd.f32 %v1822_v27, %v1821_v26  ;;  %v1824_v29 = vpop.f32.mrb[38].mxu0  ;;  %1895 = vmatprep.subr.bf16.mxu1 %v2100_v25  ;;  %v444_v26 = vld [vmem:[%s2485_s25 + $0x8] sm:$0xff] }
 0x176   : > { %v1825_v30 = vpop.f32.mrb[39].mxu0 }
 0x177   : > { %v1826_v32 = vadd.f32 %v1825_v30, %v1824_v29 }
 0x178   : > { %1896 = vmatpush3.bf16.msra.mxu1 %v2100_v25 }
 0x179   : > { %v1266_v34 = vpack.c.bf16 %v1826_v32, %v1823_v28  ;;  %v449_v32 = vld [vmem:[%s2485_s25 + $0x30] sm:$0xff] }
 0x17b   : > { %1225 = vmatmul.mubr.bf16.gmra.mrb[20].mxu1 %v2086_v31 }
 0x17c   : > { %1232 = vmatprep.mubr.bf16.mxu1 %v2087_v33  ;;  %v447_v33 = vld [vmem:[%s2485_s25 + $0x20] sm:$0xff] }
 0x183   : > { %1233 = vmatmul.mubr.bf16.gmra.mrb[24].mxu1 %v2089_v35  ;;  %v450_v35 = vld [vmem:[%s2485_s25 + $0x38] sm:$0xff] }
 0x184   : > { %1240 = vmatprep.mubr.bf16.mxu1 %v2090_v36 }
 0x18b   : > { %1241 = vmatmul.mubr.bf16.gmra.mrb[28].mxu1 %v2092_v37 }
 0x18c   : > { %1248 = vmatprep.mubr.bf16.mxu1 %v2093_v38  ;;  %v448_v38 = vld [vmem:[%s2485_s25 + $0x28] sm:$0xff] }
 0x193   : > { %1249 = vmatmul.mubr.bf16.gmra.mrb[32].mxu1 %v2095_v39 }
 0x194   : > { %1256 = vmatprep.mubr.bf16.mxu1 %v2096_v40 }
 0x19b   : > { %1257 = vmatmul.mubr.bf16.gmra.mrb[36].mxu1 %v2098_v41 }
 0x19c   : > { %1897 = vmatprep.mubr.msk.bf16.mxu1 %vm804_vm0, %v1265_v24 }
 0x1a3   : > { %1898 = vmatmul.mubr.msk.bf16.vlgmr.msra.gmra.mrb[0].mxu1 %vm804_vm0, %v1266_v34 }
 0x246   : > { %v1827_v42 = vpop.f32.mrb[16].mxu1 }
 0x247   : > { %v1828_v43 = vpop.f32.mrb[17].mxu1 }
 0x248   : > { %v1829_v44 = vadd.f32 %v1828_v43, %v1827_v42  ;;  %v1830_v45 = vpop.f32.mrb[18].mxu1 }
 0x249   : > { %v1831_v46 = vpop.f32.mrb[19].mxu1 }
 0x24a   : > { %v1832_v47 = vadd.f32 %v1831_v46, %v1830_v45  ;;  %v451_v45 = vld [vmem:[%s2485_s25 + $0x40] sm:$0xff] }
 0x24c   : > { %v1267_v48 = vpack.c.bf16 %v1832_v47, %v1829_v44  ;;  %v453_v44 = vld [vmem:[%s2485_s25 + $0x50] sm:$0xff]  ;;  %v454_v47 = vld [vmem:[%s2485_s25 + $0x58] sm:$0xff] }
 0x24e   : > { %v1833_v49 = vpop.f32.mrb[20].mxu1  ;;  %1901 = vmatprep.mubr.msk.bf16.mxu1 %vm804_vm0, %v1267_v48 }
 0x24f   : > { %v1834_v50 = vpop.f32.mrb[21].mxu1 }
 0x250   : > { %v1835_v51 = vadd.f32 %v1834_v50, %v1833_v49  ;;  %v1836_v52 = vpop.f32.mrb[22].mxu1  ;;  %v452_v50 = vld [vmem:[%s2485_s25 + $0x48] sm:$0xff] }
 0x251   : > { %v1837_v53 = vpop.f32.mrb[23].mxu1 }
 0x252   : > { %v1838_v54 = vadd.f32 %v1837_v53, %v1836_v52 }
 0x254   : > { %v1268_v55 = vpack.c.bf16 %v1838_v54, %v1835_v51 }
 0x256   : > { %v1839_v56 = vpop.f32.mrb[24].mxu1  ;;  %1902 = vmatmul.mubr.msk.bf16.gmra.mrb[4].mxu1 %vm804_vm0, %v1268_v55 }
 0x257   : > { %v1840_v57 = vpop.f32.mrb[25].mxu1 }
 0x258   : > { %v1841_v58 = vadd.f32 %v1840_v57, %v1839_v56  ;;  %v1842_v59 = vpop.f32.mrb[26].mxu1  ;;  %v457_v56 = vld [vmem:[%s2485_s25 + $0x70] sm:$0xff]  ;;  %v455_v57 = vld [vmem:[%s2485_s25 + $0x60] sm:$0xff] }
 0x259   : > { %v1843_v60 = vpop.f32.mrb[27].mxu1 }
 0x25a   : > { %v1844_v61 = vadd.f32 %v1843_v60, %v1842_v59  ;;  %v458_v59 = vld [vmem:[%s2485_s25 + $0x78] sm:$0xff] }
 0x25c   : > { %v1269_v62 = vpack.c.bf16 %v1844_v61, %v1841_v58 }
 0x25e   : > { %v1845_v63 = vpop.f32.mrb[28].mxu1  ;;  %1905 = vmatprep.mubr.msk.bf16.mxu1 %vm804_vm0, %v1269_v62  ;;  %v456_v62 = vld [vmem:[%s2485_s25 + $0x68] sm:$0xff] }
 0x25f   : > { %v1846_v0 = vpop.f32.mrb[29].mxu1 }
 0x260   : > { %v1847_v1 = vadd.f32 %v1846_v0, %v1845_v63  ;;  %v1848_v2 = vpop.f32.mrb[30].mxu1 }
 0x261   : > { %v1849_v3 = vpop.f32.mrb[31].mxu1 }
 0x262   : > { %v1850_v4 = vadd.f32 %v1849_v3, %v1848_v2 }
 0x264   : > { %v1270_v5 = vpack.c.bf16 %v1850_v4, %v1847_v1 }
 0x266   : > { %v1851_v6 = vpop.f32.mrb[32].mxu1  ;;  %1906 = vmatmul.mubr.msk.bf16.gmra.mrb[8].mxu1 %vm804_vm0, %v1270_v5 }
 0x267   : > { %v1852_v7 = vpop.f32.mrb[33].mxu1 }
 0x268   : > { %v1853_v9 = vadd.f32 %v1852_v7, %v1851_v6  ;;  %v1854_v10 = vpop.f32.mrb[34].mxu1 }
 0x269   : > { %v1855_v11 = vpop.f32.mrb[35].mxu1 }
 0x26a   : > { %v1856_v8 = vadd.f32 %v1855_v11, %v1854_v10 }
 0x26c   : > { %v1271_v12 = vpack.c.bf16 %v1856_v8, %v1853_v9 }
 0x26e   : > { %v1857_v13 = vpop.f32.mrb[36].mxu1  ;;  %1909 = vmatprep.mubr.msk.bf16.mxu1 %vm804_vm0, %v1271_v12 }
 0x26f   : > { %v1858_v14 = vpop.f32.mrb[37].mxu1 }
 0x270   : > { %v1859_v15 = vadd.f32 %v1858_v14, %v1857_v13  ;;  %v1860_v16 = vpop.f32.mrb[38].mxu1 }
 0x271   : > { %v1861_v17 = vpop.f32.mrb[39].mxu1 }
 0x272   : > { %v1862_v18 = vadd.f32 %v1861_v17, %v1860_v16 }
 0x274   : > { %v1272_v19 = vpack.c.bf16 %v1862_v18, %v1859_v15 }
 0x276   : > { %v1899_v22 = vpop.f32.mrb[0].mxu1  ;;  %1910 = vmatmul.mubr.msk.bf16.gmra.mrb[12].mxu1 %vm804_vm0, %v1272_v19 }
 0x277   : > { %v1929_v24 = vadd.f32 %v1899_v22, %v445_v20  ;;  %v1348_v25 = vpop.f32.mrb[1].mxu1 }
 0x278   : > { %v1930_v27 = vadd.f32 %v1348_v25, %v443_v21  ;;  %v1900_v28 = vpop.f32.mrb[2].mxu1 }
 0x279   : > { %1429 = vst.msk [vmem:[%s2492_s27 + $0x10] sm:$0xff] %vm804_vm0, %v1929_v24  ;;  %v1931_v29 = vadd.f32 %v1900_v28, %v446_v23  ;;  %v1351_v30 = vpop.f32.mrb[3].mxu1 }
 0x27a   : > { %1427 = vst.msk [vmem:[%s2492_s27] sm:$0xff] %vm804_vm0, %v1930_v27  ;;  %v1932_v31 = vadd.f32 %v1351_v30, %v444_v26 }
 0x27b   : > { %1430 = vst.msk [vmem:[%s2492_s27 + $0x18] sm:$0xff] %vm804_vm0, %v1931_v29 }
 0x27c   : > { %1428 = vst.msk [vmem:[%s2492_s27 + $0x8] sm:$0xff] %vm804_vm0, %v1932_v31 }
 0x329   : > { %v1903_v34 = vpop.f32.mrb[4].mxu1 }
 0x32a   : > { %v1933_v36 = vadd.f32 %v1903_v34, %v449_v32  ;;  %v1364_v37 = vpop.f32.mrb[5].mxu1 }
 0x32b   : > { %v1934_v39 = vadd.f32 %v1364_v37, %v447_v33  ;;  %v1904_v40 = vpop.f32.mrb[6].mxu1 }
 0x32c   : > { %1433 = vst.msk [vmem:[%s2492_s27 + $0x30] sm:$0xff] %vm804_vm0, %v1933_v36  ;;  %v1935_v41 = vadd.f32 %v1904_v40, %v450_v35  ;;  %v1367_v42 = vpop.f32.mrb[7].mxu1 }
 0x32d   : > { %1431 = vst.msk [vmem:[%s2492_s27 + $0x20] sm:$0xff] %vm804_vm0, %v1934_v39  ;;  %v1936_v43 = vadd.f32 %v1367_v42, %v448_v38 }
 0x32e   : > { %1434 = vst.msk [vmem:[%s2492_s27 + $0x38] sm:$0xff] %vm804_vm0, %v1935_v41 }
 0x32f   : > { %1432 = vst.msk [vmem:[%s2492_s27 + $0x28] sm:$0xff] %vm804_vm0, %v1936_v43 }
 0x339   : > { %v1907_v46 = vpop.f32.mrb[8].mxu1 }
 0x33a   : > { %v1937_v48 = vadd.f32 %v1907_v46, %v453_v44  ;;  %v1380_v49 = vpop.f32.mrb[9].mxu1 }
 0x33b   : > { %v1938_v51 = vadd.f32 %v1380_v49, %v451_v45  ;;  %v1908_v52 = vpop.f32.mrb[10].mxu1 }
 0x33c   : > { %1437 = vst.msk [vmem:[%s2492_s27 + $0x50] sm:$0xff] %vm804_vm0, %v1937_v48  ;;  %v1939_v53 = vadd.f32 %v1908_v52, %v454_v47  ;;  %v1383_v54 = vpop.f32.mrb[11].mxu1 }
 0x33d   : > { %1435 = vst.msk [vmem:[%s2492_s27 + $0x40] sm:$0xff] %vm804_vm0, %v1938_v51  ;;  %v1940_v55 = vadd.f32 %v1383_v54, %v452_v50 }
 0x33e   : > { %1438 = vst.msk [vmem:[%s2492_s27 + $0x58] sm:$0xff] %vm804_vm0, %v1939_v53 }
 0x33f   : > { %1436 = vst.msk [vmem:[%s2492_s27 + $0x48] sm:$0xff] %vm804_vm0, %v1940_v55 }
 0x349   : > { %v1911_v58 = vpop.f32.mrb[12].mxu1 }
 0x34a   : > { %v1941_v60 = vadd.f32 %v1911_v58, %v457_v56  ;;  %v1396_v61 = vpop.f32.mrb[13].mxu1 }
 0x34b   : > { %v1942_v63 = vadd.f32 %v1396_v61, %v455_v57  ;;  %v1912_v0 = vpop.f32.mrb[14].mxu1 }
 0x34c   : > { %1441 = vst.msk [vmem:[%s2492_s27 + $0x70] sm:$0xff] %vm804_vm0, %v1941_v60  ;;  %v1943_v1 = vadd.f32 %v1912_v0, %v458_v59  ;;  %v1399_v2 = vpop.f32.mrb[15].mxu1 }
 0x34d   : > { %1439 = vst.msk [vmem:[%s2492_s27 + $0x60] sm:$0xff] %vm804_vm0, %v1942_v63  ;;  %v1944_v3 = vadd.f32 %v1399_v2, %v456_v62 }
 0x34e   : > { %1442 = vst.msk [vmem:[%s2492_s27 + $0x78] sm:$0xff] %vm804_vm0, %v1943_v1 }
 0x34f   : > { %1440 = vst.msk [vmem:[%s2492_s27 + $0x68] sm:$0xff] %vm804_vm0, %v1944_v3 }
 0x350 PF: > { %s14_s21 = sadd.s32 1, %s2155_s21   ;;  %s2567_s15 = smov %s2135_s16 }
 0x351   : > { %p11_p12 = scmp.ge.s32.totalorder %s14_s21, 6   ;;  %s2568_s16 = smov %s2233_s28 }
 0x352   : > { %s2569_s17 = smov %s2147_s19  ;;  %s2570_s18 = smov %s2151_s20 }
 0x353   : > { %s2571_s19 = smov %s2574_s22  ;;  %s2572_s20 = smov %s2578_s23 }
 0x354   :  { %13 = sbr.rel (!%p11_p12) target bundleno = 4 (0x4), region = 118 }

</bundles_post_ra>
